<compile_context>
chip_gen: v7x
topology: tpu7x:2x2x1
jax: 0.10.0
libtpu: 0.0.40
codegen_flags: <defaults>
</compile_context>

<pallas_src>
import functools

import jax
import jax.numpy as jnp
from jax import lax
from jax.experimental import pallas as pl
from jax.experimental.pallas import tpu as pltpu


def _round_up(x, m):
    return ((x + m - 1) // m) * m


def _pick_row_tile(rows, cap=1024):
    """Largest 128-aligned tile <= cap that divides `rows` (rows is a mult of 128)."""
    for t in (1024, 512, 256, 128):
        if t <= cap and rows % t == 0:
            return t
    return 128


# ----------------------- stage 1: feature projection -------------------------
def _project_kernel(x_ref, w_ref, z_ref):
    z_ref[...] = jnp.dot(x_ref[...], w_ref[...],
                         preferred_element_type=jnp.float32).astype(z_ref.dtype)


def _project(x_p, w_p):
    """Z = X @ W (bf16 in/out, f32 MXU accumulation), tiled over rows."""
    rows, c_p = x_p.shape
    f_p = w_p.shape[1]
    row_tile = _pick_row_tile(rows)
    grid = (rows // row_tile,)
    return pl.pallas_call(
        _project_kernel,
        out_shape=jax.ShapeDtypeStruct((rows, f_p), jnp.bfloat16),
        grid_spec=pltpu.PrefetchScalarGridSpec(
            num_scalar_prefetch=0,
            grid=grid,
            in_specs=[pl.BlockSpec((row_tile, c_p), lambda i: (i, 0)),
                      pl.BlockSpec((c_p, f_p), lambda i: (0, 0))],
            out_specs=pl.BlockSpec((row_tile, f_p), lambda i: (i, 0))),
        compiler_params=pltpu.CompilerParams(
            dimension_semantics=("parallel",),
            vmem_limit_bytes=32 * 1024 * 1024),
    )(x_p, w_p)


# ------------------- stage 2: aggregation + epilogue --------------------------
def _agg_kernel(a_ref, z_ref, zr_ref, b_ref, dinv_ref, o_ref, acc_ref,
                *, f_valid, apply_relu, apply_logsoftmax):
    k = pl.program_id(1)

    @pl.when(k == 0)
    def _():
        acc_ref[...] = jnp.zeros_like(acc_ref)

    # sum aggregation over this slab of source nodes: [tm, tk] @ [tk, Fp]
    acc_ref[...] += jnp.dot(a_ref[...], z_ref[...],
                            preferred_element_type=jnp.float32)

    @pl.when(k == pl.num_programs(1) - 1)
    def _():
        # mean normalization (f32 inverse degree), bias, root term
        out = (acc_ref[...] * dinv_ref[...]
               + zr_ref[...].astype(jnp.float32) + b_ref[...])

        if apply_relu:
            out = jnp.maximum(out, 0.0)

        if apply_logsoftmax:
            # Mask padded class columns so they never contribute to softmax;
            # padded columns end up at ~-1e30 (harmless, sliced off outside).
            cols = lax.broadcasted_iota(jnp.int32, out.shape, 1)
            valid = cols < f_valid
            logits = jnp.where(valid, out, jnp.float32(-1e30))
            m = jnp.max(logits, axis=-1, keepdims=True)
            e = jnp.where(valid, jnp.exp(logits - m), 0.0)
            lse = jnp.log(jnp.sum(e, axis=-1, keepdims=True))
            out = logits - m - lse

        o_ref[...] = out.astype(o_ref.dtype)


def _aggregate(a_p, z_l, z_r, b_p, dinv_p, tm, tk, f_out,
               relu, logsoftmax, out_dtype):
    t_p, n_p = a_p.shape
    f_p = z_l.shape[1]
    grid = (t_p // tm, n_p // tk)

    kernel = functools.partial(_agg_kernel, f_valid=f_out,
                               apply_relu=relu, apply_logsoftmax=logsoftmax)

    cost = pl.CostEstimate(
        flops=int(2 * t_p * n_p * f_p),
        transcendentals=int(t_p * f_p) if logsoftmax else 0,
        bytes_accessed=int(a_p.size * 2                        # A streamed once
                           + (t_p // tm) * n_p * f_p * 2       # Z re-read per T-tile
                           + z_r.size * 2
                           + dinv_p.size * 4 + f_p * 4
                           + t_p * f_p * jnp.dtype(out_dtype).itemsize))

    return pl.pallas_call(
        kernel,
        out_shape=jax.ShapeDtypeStruct((t_p, f_p), out_dtype),
        grid_spec=pltpu.PrefetchScalarGridSpec(
            num_scalar_prefetch=0,
            grid=grid,
            in_specs=[pl.BlockSpec((tm, tk), lambda i, k: (i, k)),      # A tile
                      pl.BlockSpec((tk, f_p), lambda i, k: (k, 0)),     # Z_l slab
                      pl.BlockSpec((tm, f_p), lambda i, k: (i, 0)),     # Z_r (root)
                      pl.BlockSpec((1, f_p), lambda i, k: (0, 0)),      # bias
                      pl.BlockSpec((tm, 1), lambda i, k: (i, 0))],      # 1/deg
            out_specs=pl.BlockSpec((tm, f_p), lambda i, k: (i, 0)),
            scratch_shapes=[pltpu.VMEM((tm, f_p), jnp.float32)]),
        compiler_params=pltpu.CompilerParams(
            dimension_semantics=("parallel", "arbitrary"),
            vmem_limit_bytes=48 * 1024 * 1024),
        cost_estimate=cost,
    )(a_p, z_l, z_r, b_p, dinv_p)


# ----------------------------- adjacency build ---------------------------------
def build_adj_padded(edge_index, n_tgt, n_src, t_p, n_p):
    """Dense count adjacency built directly at the padded (t_p, n_p) shape.
    Entries are small integers (exact in bf16); mean normalization is returned
    as a separate f32 inverse-degree column and applied inside the kernel."""
    src, dst = edge_index[0], edge_index[1]
    a = jnp.zeros((t_p, n_p), jnp.float32).at[dst, src].add(1.0)
    deg = a.sum(axis=1, keepdims=True)
    dinv = jnp.where(deg > 0, 1.0 / deg, 0.0).astype(jnp.float32)
    return a.astype(jnp.bfloat16), dinv


# ----------------------------- one SAGEConv layer -----------------------------
def sage_layer(edge_index, x_src, n_src, n_tgt, w_l, b_l, w_r,
               *, relu=False, logsoftmax=False, out_dtype=jnp.float32):
    """out = mean-agg(A, X @ W_l) + b_l + X[:n_tgt] @ W_r  [+ fused epilogue]."""
    c_in = x_src.shape[1]
    f_out = w_l.shape[1]

    # Padded, lane-dense dims and tile sizes.
    c_p = _round_up(c_in, 128)
    f_p = _round_up(f_out, 128)

    tk = min(2048, _round_up(n_src, 128))     # reduction (source-node) tile
    n_p = _round_up(n_src, tk)

    tm = min(512, _round_up(n_tgt, 128))      # target-row tile
    if tm >= 256 and _round_up(n_tgt, tm) == tm:
        half = tm // 2
        if half % 128 == 0 and _round_up(n_tgt, half) == tm:
            tm = half                          # keep >=2 T-tiles (v7x megacore)
    t_p = _round_up(n_tgt, tm)

    # Pad + cast to bf16 at the boundary (f32 accumulation inside the kernels).
    x_p = jnp.pad(x_src[:n_src],
                  ((0, n_p - n_src), (0, c_p - c_in))).astype(jnp.bfloat16)
    x_t = jnp.pad(x_src[:n_tgt],
                  ((0, t_p - n_tgt), (0, c_p - c_in))).astype(jnp.bfloat16)
    wl_p = jnp.pad(w_l, ((0, c_p - c_in), (0, f_p - f_out))).astype(jnp.bfloat16)
    wr_p = jnp.pad(w_r, ((0, c_p - c_in), (0, f_p - f_out))).astype(jnp.bfloat16)
    b_p = jnp.pad(b_l, (0, f_p - f_out)).astype(jnp.float32).reshape(1, f_p)

    # Adjacency built directly at padded shape (no extra O(T*N) pad copy).
    a_p, dinv_p = build_adj_padded(edge_index, n_tgt, n_src, t_p, n_p)

    # Stage 1: projections (reassociated matmul chain).
    z_l = _project(x_p, wl_p)     # all source rows
    z_r = _project(x_t, wr_p)     # target rows only (root term), no slice/re-pad

    # Stage 2: tiled aggregation + fused epilogue.
    out = _aggregate(a_p, z_l, z_r, b_p, dinv_p, tm, tk, f_out,
                     relu, logsoftmax, out_dtype)
    return out[:n_tgt, :f_out]


# ------------------------------- glue (JAX) -----------------------------------
def sage_forward(x, adjs, params):
    """adjs: list of (edge_index, size) per layer, size = (n_src, n_tgt)."""
    num_layers = len(params)
    for i, (edge_index, size) in enumerate(adjs):
        n_src, n_tgt = size
        w_l, b_l, w_r = params[i]
        is_last = (i == num_layers - 1)
        # hidden activations stay bf16 (halves HBM traffic); final layer f32
        x = sage_layer(edge_index, x, n_src, n_tgt, w_l, b_l, w_r,
                       relu=not is_last, logsoftmax=is_last,
                       out_dtype=jnp.float32 if is_last else jnp.bfloat16)
        # TODO(synk): F.dropout(p=0.5) is identity in eval mode; not implemented.
    return x


def sage_reference(x, adjs, params):
    """Pure-JAX f32 reference for correctness checking."""
    h = x.astype(jnp.float32)
    num_layers = len(params)
    for i, (edge_index, size) in enumerate(adjs):
        n_src, n_tgt = size
        src, dst = edge_index[0], edge_index[1]
        a = jnp.zeros((n_tgt, n_src), jnp.float32).at[dst, src].add(1.0)
        deg = a.sum(axis=1, keepdims=True)
        a = a / jnp.maximum(deg, 1.0)
        w_l, b_l, w_r = params[i]
        out = a @ (h[:n_src] @ w_l) + b_l[None, :] + h[:n_tgt] @ w_r
        if i != num_layers - 1:
            out = jnp.maximum(out, 0.0)
        else:
            out = jax.nn.log_softmax(out, axis=-1)
        h = out
    return h


# --------------------------------- main ---------------------------------------
if __name__ == "__main__":
    key = jax.random.PRNGKey(0)

    # Small synthetic neighbor-sampler style bipartite graphs.
    N = 128      # source nodes, layer 0
    T1 = 64      # targets of layer 0 == sources of layer 1
    T2 = 32      # final targets
    E1, E2 = 512, 256
    C_IN, HID, C_OUT = 32, 32, 16

    ks = jax.random.split(key, 8)
    x = jax.random.normal(ks[0], (N, C_IN), jnp.float32)

    ei1 = jnp.stack([jax.random.randint(ks[1], (E1,), 0, N),
                     jax.random.randint(ks[2], (E1,), 0, T1)]).astype(jnp.int32)
    ei2 = jnp.stack([jax.random.randint(ks[3], (E2,), 0, T1),
                     jax.random.randint(ks[4], (E2,), 0, T2)]).astype(jnp.int32)
    adjs = [(ei1, (N, T1)), (ei2, (T1, T2))]

    def init_linear(k, fan_in, fan_out):
        kw, kb = jax.random.split(k)
        scale = 1.0 / jnp.sqrt(fan_in)
        w = jax.random.uniform(kw, (fan_in, fan_out), jnp.float32, -scale, scale)
        b = jax.random.uniform(kb, (fan_out,), jnp.float32, -scale, scale)
        return w, b

    # Layer params: (W_l [in,out], b_l [out], W_r [in,out]) — W_r has no bias.
    wl1, bl1 = init_linear(ks[5], C_IN, HID)
    wr1, _ = init_linear(ks[6], C_IN, HID)
    wl2, bl2 = init_linear(ks[7], HID, C_OUT)
    wr2, _ = init_linear(jax.random.fold_in(key, 99), HID, C_OUT)
    params = [(wl1, bl1, wr1), (wl2, bl2, wr2)]

    out = sage_forward(x, adjs, params)
    out = jax.block_until_ready(out)

    assert out.shape == (T2, C_OUT)
    # log_softmax rows must sum to ~1 after exp (epilogue computed in f32)
    assert jnp.allclose(jnp.exp(out).sum(axis=-1), 1.0, atol=1e-4)
    # compare against pure-JAX f32 reference (bf16 matmul inputs -> loose tol)
    ref = sage_reference(x, adjs, params)
    assert float(jnp.max(jnp.abs(out - ref))) < 0.25
    print("KERNEL_OK")
</pallas_src>

<mosaic_0001>
module attributes {stable_mosaic.version = 11 : i64} {
  func.func @_project_kernel(%arg0: i32, %arg1: memref<128x128xbf16, #tpu.memory_space<vmem>>, %arg2: memref<128x128xbf16, #tpu.memory_space<vmem>>, %arg3: memref<128x128xbf16, #tpu.memory_space<vmem>>) attributes {dimension_semantics = [#tpu.dimension_semantics<parallel>], iteration_bounds = array<i64: 1>, scalar_prefetch = 0 : i64, scratch_operands = 0 : i64, tpu.core_type = #tpu.core_type<tc>, window_params = [{transform_indices = @transform_0, window_bounds = array<i64: 128, 128>}, {pipeline_mode = #tpu.pipeline_mode<synchronous>, transform_indices = @transform_1, window_bounds = array<i64: 128, 128>}, {transform_indices = @transform_2, window_bounds = array<i64: 128, 128>}]} {
    %c0 = arith.constant 0 : index
    %c0_0 = arith.constant 0 : index
    %0 = vector.load %arg1[%c0, %c0_0] : memref<128x128xbf16, #tpu.memory_space<vmem>>, vector<128x128xbf16>
    %c0_1 = arith.constant 0 : index
    %c0_2 = arith.constant 0 : index
    %1 = vector.load %arg2[%c0_1, %c0_2] : memref<128x128xbf16, #tpu.memory_space<vmem>>, vector<128x128xbf16>
    %cst = arith.constant dense<0.000000e+00> : vector<128x128xf32>
    %2 = tpu.matmul %0, %1, %cst {dimension_numbers = #tpu.dot_dimension_numbers<[1], [0], [0], [1], [0, 0, 1, 1], [], []>} : vector<128x128xbf16>, vector<128x128xbf16>, vector<128x128xf32> -> vector<128x128xf32>
    %3 = arith.truncf %2 : vector<128x128xf32> to vector<128x128xbf16>
    %c0_3 = arith.constant 0 : index
    %c0_4 = arith.constant 0 : index
    %4 = vector.load %arg3[%c0_3, %c0_4] : memref<128x128xbf16, #tpu.memory_space<vmem>>, vector<128x128xbf16>
    tpu.vector_store %arg3[%c0_3, %c0_4], %3 {strides = array<i32>} : memref<128x128xbf16, #tpu.memory_space<vmem>>, vector<128x128xbf16>,
    return
  }
  func.func @transform_0(%arg0: i32) -> (i32, i32) {
    %c0_i32 = arith.constant 0 : i32
    %c0_i32_0 = arith.constant 0 : i32
    return %arg0, %c0_i32 : i32, i32
  }
  func.func @transform_1(%arg0: i32) -> (i32, i32) {
    %c0_i32 = arith.constant 0 : i32
    %c0_i32_0 = arith.constant 0 : i32
    %c0_i32_1 = arith.constant 0 : i32
    return %c0_i32, %c0_i32_0 : i32, i32
  }
  func.func @transform_2(%arg0: i32) -> (i32, i32) {
    %c0_i32 = arith.constant 0 : i32
    %c0_i32_0 = arith.constant 0 : i32
    return %arg0, %c0_i32 : i32, i32
  }
}

</mosaic_0001>

<bundles_post_ra>
// kernel: tpu_custom_call.1
= control target key start
LH: loop header
LB: loop body
LE: loop exit
PB: predicated region body
PF: predicated region fallthrough
CT: control target
= control target key end

     0   :  { %7 = vsyncpa [#allocation3], 0  ;;  %s681_s0 = inlined_call_operand.hbm [shape: bf16[128,128], index: 0, kind: input, shape index: {}]   ;;  %s682_s1 = inlined_call_operand.hbm [shape: bf16[128,128], index: 1, kind: input, shape index: {}]   ;;  %s683_s2 = inlined_call_operand.hbm [shape: bf16[128,128], index: 2, kind: output, shape index: {}]  }
   0x1   :  { %8 = vsyncpa [#allocation6], 0 }
   0x2   :  { %9 = vsyncpa [#allocation4], 0  ;;  %s616_s9 = smov [#allocation2]   ;;  %s544_s13 = scalar_lea.hbm %s681_s0, 1024 }
   0x3   :  { %s15_s10 = sshll.u32 %s616_s9, 4  ;;  %p545_p0 = scmp.ne.s32.totalorder %s681_s0, %s544_s13  ;;  %s16_s10 = int_to_ptr.vmem [resolvable:$true] %s15_s10 }
   0x4   :  { %p548_p1 = scmp.lt.u32.totalorder %s544_s13, %s681_s0 }
   0x6   :  { %p550_p2 = pnand %p548_p1, %p545_p0 }
   0x8   :  { %553 = shalt.err (!%p550_p2)
}
   0x9   :  { %s554_s18 = scalar_lea.vmem %s16_s10, 1024  ;;  %p559_p4 = scmp.lt.s32.totalorder %s16_s10, %s16_s10 }
   0xa   :  { %p555_p3 = scmp.ne.s32.totalorder %s16_s10, %s554_s18  ;;  %p560_p5 = scmp.lt.s32.totalorder %s554_s18, %s554_s18 }
   0xc   :  { %p561_p6 = por %p560_p5, %p559_p4 }
   0xe   :  { %p562_p7 = pnand %p561_p6, %p555_p3 }
  0x10   :  { %565 = shalt.err (!%p562_p7)
}
  0x11   :  { %s617_s19 = smov 64   ;;  %s618_s20 = smov 4  }
  0x12   :  { %21 = dma.hbm_to_vmem [thread:$0]  %s681_s0, 1024, %s16_s10, [#allocation3], %s617_s19, %s617_s19, %s618_s20  }
  0x13   :  { %s619_s23 = smov [#allocation5]   ;;  %s566_s27 = scalar_lea.hbm %s682_s1, 1024 }
  0x14   :  { %s27_s24 = sshll.u32 %s619_s23, 4  ;;  %p567_p8 = scmp.ne.s32.totalorder %s682_s1, %s566_s27  ;;  %s28_s24 = int_to_ptr.vmem [resolvable:$true] %s27_s24 }
  0x15   :  { %p570_p9 = scmp.lt.u32.totalorder %s566_s27, %s682_s1 }
  0x17   :  { %p572_p10 = pnand %p570_p9, %p567_p8 }
  0x19   :  { %575 = shalt.err (!%p572_p10)
}
  0x1a   :  { %s576_s4 = scalar_lea.vmem %s28_s24, 1024  ;;  %p581_p12 = scmp.lt.s32.totalorder %s28_s24, %s28_s24 }
  0x1b   :  { %p577_p11 = scmp.ne.s32.totalorder %s28_s24, %s576_s4  ;;  %p582_p13 = scmp.lt.s32.totalorder %s576_s4, %s576_s4 }
  0x1d   :  { %p583_p0 = por %p582_p13, %p581_p12 }
  0x1f   :  { %p584_p1 = pnand %p583_p0, %p577_p11 }
  0x21   :  { %587 = shalt.err (!%p584_p1)
}
  0x22   :  { %33 = dma.hbm_to_vmem [thread:$0]  %s682_s1, 1024, %s28_s24, [#allocation6], %s617_s19, %s617_s19, %s618_s20  }
  0x23   :  { %610 = dma.done.wait [#allocation3], 1024  }
  0x24   :  { %611 = vsyncadd [#allocation3], 4294966272 }
  0x25   :  { %612 = dma.done.wait [#allocation6], 1024  }
  0x26   :  { %613 = vsyncadd [#allocation6], 4294966272  ;;  %v528_v0 = vld [vmem:[#allocation5] sm:$0xff]   ;;  %v529_v1 = vld [vmem:[#allocation5 + $0x8] sm:$0xff]   ;;  %s620_s1 = smov [#allocation7]  }
  0x27   :  { %475 = vmatprep.subr.bf16.mxu0 %v528_v0  ;;  %507 = vmatprep.subr.bf16.mxu1 %v528_v0  ;;  %v530_v2 = vld [vmem:[#allocation5 + $0x10] sm:$0xff]   ;;  %v531_v3 = vld [vmem:[#allocation5 + $0x18] sm:$0xff]   ;;  %v536_v4 = vld [vmem:[#allocation2] sm:$0xff]   ;;  %s351_s6 = sshll.u32 %s620_s1, 4  ;;  %s352_s6 = int_to_ptr.vmem [resolvable:$true] %s351_s6 }
  0x28   :  { %476 = vmatpush3.bf16.msra.mxu0 %v528_v0  ;;  %515 = vmatpush3.bf16.msra.mxu1 %v528_v0  ;;  %v537_v5 = vld [vmem:[#allocation2 + $0x20] sm:$0xff]   ;;  %v533_v7 = vld [vmem:[#allocation5 + $0x28] sm:$0xff]   ;;  %v534_v8 = vld [vmem:[#allocation5 + $0x30] sm:$0xff]   ;;  %s588_s7 = scalar_lea.vmem %s352_s6, 1024  ;;  %p593_p3 = scmp.lt.s32.totalorder %s352_s6, %s352_s6 }
  0x29   :  { %477 = vmatprep.subr.bf16.mxu0 %v529_v1  ;;  %508 = vmatprep.subr.bf16.mxu1 %v529_v1  ;;  %v532_v6 = vld [vmem:[#allocation5 + $0x20] sm:$0xff]   ;;  %v535_v9 = vld [vmem:[#allocation5 + $0x38] sm:$0xff]   ;;  %v538_v10 = vld [vmem:[#allocation2 + $0x8] sm:$0xff]   ;;  %p589_p2 = scmp.ne.s32.totalorder %s352_s6, %s588_s7  ;;  %p594_p4 = scmp.lt.s32.totalorder %s588_s7, %s588_s7 }
  0x2a   :  { %491 = vmatprep.mubr.bf16.mxu0 %v536_v4  ;;  %499 = vmatprep.mubr.bf16.mxu1 %v537_v5  ;;  %v539_v11 = vld [vmem:[#allocation2 + $0x28] sm:$0xff]   ;;  %v540_v12 = vld [vmem:[#allocation2 + $0x10] sm:$0xff]   ;;  %v542_v14 = vld [vmem:[#allocation2 + $0x18] sm:$0xff]  }
  0x2b   :  { %v541_v13 = vld [vmem:[#allocation2 + $0x30] sm:$0xff]   ;;  %v543_v15 = vld [vmem:[#allocation2 + $0x38] sm:$0xff]   ;;  %p595_p5 = por %p594_p4, %p593_p3 }
  0x2c   :  { %478 = vmatpush3.bf16.msra.mxu0 %v529_v1  ;;  %516 = vmatpush3.bf16.msra.mxu1 %v529_v1 }
  0x2d   :  { %479 = vmatprep.subr.bf16.mxu0 %v530_v2  ;;  %509 = vmatprep.subr.bf16.mxu1 %v530_v2  ;;  %p596_p6 = pnand %p595_p5, %p589_p2 }
  0x30   :  { %480 = vmatpush3.bf16.msra.mxu0 %v530_v2  ;;  %517 = vmatpush3.bf16.msra.mxu1 %v530_v2 }
  0x31   :  { %481 = vmatprep.subr.bf16.mxu0 %v531_v3  ;;  %510 = vmatprep.subr.bf16.mxu1 %v531_v3 }
  0x34   :  { %482 = vmatpush3.bf16.msra.mxu0 %v531_v3  ;;  %518 = vmatpush3.bf16.msra.mxu1 %v531_v3 }
  0x35   :  { %483 = vmatprep.subr.bf16.mxu0 %v532_v6  ;;  %511 = vmatprep.subr.bf16.mxu1 %v532_v6 }
  0x38   :  { %484 = vmatpush3.bf16.msra.mxu0 %v532_v6  ;;  %519 = vmatpush3.bf16.msra.mxu1 %v532_v6 }
  0x39   :  { %485 = vmatprep.subr.bf16.mxu0 %v533_v7  ;;  %512 = vmatprep.subr.bf16.mxu1 %v533_v7 }
  0x3c   :  { %486 = vmatpush3.bf16.msra.mxu0 %v533_v7  ;;  %520 = vmatpush3.bf16.msra.mxu1 %v533_v7 }
  0x3d   :  { %487 = vmatprep.subr.bf16.mxu0 %v534_v8  ;;  %513 = vmatprep.subr.bf16.mxu1 %v534_v8 }
  0x40   :  { %488 = vmatpush3.bf16.msra.mxu0 %v534_v8  ;;  %521 = vmatpush3.bf16.msra.mxu1 %v534_v8 }
  0x41   :  { %489 = vmatprep.subr.bf16.mxu0 %v535_v9  ;;  %514 = vmatprep.subr.bf16.mxu1 %v535_v9 }
  0x44   :  { %490 = vmatpush3.bf16.msra.mxu0 %v535_v9  ;;  %522 = vmatpush3.bf16.msra.mxu1 %v535_v9 }
  0x47   :  { %492 = vmatmul.mubr.bf16.vlgmr.msra.gmra.mrb[0].mxu0 %v538_v10  ;;  %500 = vmatmul.mubr.bf16.vlgmr.msra.gmra.mrb[0].mxu1 %v539_v11 }
  0x48   :  { %495 = vmatprep.mubr.bf16.mxu0 %v540_v12  ;;  %503 = vmatprep.mubr.bf16.mxu1 %v541_v13 }
  0x4f   :  { %496 = vmatmul.mubr.bf16.gmra.mrb[4].mxu0 %v542_v14  ;;  %504 = vmatmul.mubr.bf16.gmra.mrb[4].mxu1 %v543_v15 }
 0x11a   :  { %v493_v16 = vpop.f32.mrb[0].mxu0  ;;  %v501_v17 = vpop.f32.mrb[0].mxu1 }
 0x11b   :  { %v203_v18 = vpop.f32.mrb[1].mxu0  ;;  %v235_v19 = vpop.f32.mrb[1].mxu1 }
 0x11c   :  { %v494_v20 = vpop.f32.mrb[2].mxu0  ;;  %v502_v21 = vpop.f32.mrb[2].mxu1 }
 0x11d   :  { %v420_v22 = vpack.c.bf16 %v494_v20, %v493_v16  ;;  %v440_v23 = vpack.c.bf16 %v502_v21, %v501_v17  ;;  %v206_v24 = vpop.f32.mrb[3].mxu0  ;;  %v238_v25 = vpop.f32.mrb[3].mxu1 }
 0x11e   :  { %v415_v26 = vpack.c.bf16 %v206_v24, %v203_v18  ;;  %v435_v27 = vpack.c.bf16 %v238_v25, %v235_v19 }
 0x11f   :  { %452 = vst [vmem:[#allocation7 + $0x8] sm:$0xff] %v420_v22   ;;  %456 = vst [vmem:[#allocation7 + $0x28] sm:$0xff] %v440_v23  }
 0x120   :  { %416 = vst [vmem:[#allocation7] sm:$0xff] %v415_v26   ;;  %455 = vst [vmem:[#allocation7 + $0x20] sm:$0xff] %v435_v27  }
 0x122   :  { %v497_v28 = vpop.f32.mrb[4].mxu0  ;;  %v505_v29 = vpop.f32.mrb[4].mxu1 }
 0x123   :  { %v219_v30 = vpop.f32.mrb[5].mxu0  ;;  %v251_v31 = vpop.f32.mrb[5].mxu1 }
 0x124   :  { %v498_v32 = vpop.f32.mrb[6].mxu0  ;;  %v506_v33 = vpop.f32.mrb[6].mxu1 }
 0x125   :  { %v430_v34 = vpack.c.bf16 %v498_v32, %v497_v28  ;;  %v450_v35 = vpack.c.bf16 %v506_v33, %v505_v29  ;;  %v222_v36 = vpop.f32.mrb[7].mxu0  ;;  %v254_v37 = vpop.f32.mrb[7].mxu1 }
 0x126   :  { %v425_v38 = vpack.c.bf16 %v222_v36, %v219_v30  ;;  %v445_v39 = vpack.c.bf16 %v254_v37, %v251_v31 }
 0x127   :  { %454 = vst [vmem:[#allocation7 + $0x18] sm:$0xff] %v430_v34   ;;  %458 = vst [vmem:[#allocation7 + $0x38] sm:$0xff] %v450_v35  }
 0x128   :  { %453 = vst [vmem:[#allocation7 + $0x10] sm:$0xff] %v425_v38   ;;  %457 = vst [vmem:[#allocation7 + $0x30] sm:$0xff] %v445_v39  }
 0x129   :  { %599 = shalt.err (!%p596_p6)
}
 0x12a   :  { %s600_s10 = scalar_lea.hbm %s683_s2, 1024 }
 0x12b   :  { %p601_p7 = scmp.ne.s32.totalorder %s683_s2, %s600_s10  ;;  %p604_p8 = scmp.lt.u32.totalorder %s600_s10, %s683_s2 }
 0x12d   :  { %p606_p9 = pnand %p604_p8, %p601_p7 }
 0x12f   :  { %609 = shalt.err (!%p606_p9)
}
 0x130   :  { %357 = dma.vmem_to_hbm [thread:$0]  %s352_s6, 1024, %s683_s2, [#allocation4], %s617_s19, %s617_s19, %s618_s20  }
 0x131   :  { %614 = dma.done.wait [#allocation4], 1024  }
 0x132   :  { %615 = vsyncadd [#allocation4], 4294966272 }
 0x133   :  { %361 = vsyncpa [#allocation3], 1 }
 0x134   :  { %362 = vsyncpa [#allocation6], 1 }
 0x135   :  { %363 = vsyncpa [#allocation4], 1 }

</bundles_post_ra>
